<compile_context>
chip_gen: v5e
topology: v5e:2x2
jax: 0.10.0
libtpu: 0.0.40
codegen_flags: <defaults>
</compile_context>

<pallas_src>
import functools
import math

import jax
import jax.numpy as jnp
from jax.experimental import pallas as pl
from jax.experimental.pallas import tpu as pltpu


# ----------------------------------------------------------------------------
# pltpu.roll direction probe
# ----------------------------------------------------------------------------
# The kernel relies on "result[i] = x[i - shift]" (jnp.roll convention).  Probe
# it once on the device so the tap extraction is correct regardless of the
# rotation convention of the installed jax/Mosaic version.
_ROLL_IS_JNP = None


def _roll_matches_jnp_roll() -> bool:
    global _ROLL_IS_JNP
    if _ROLL_IS_JNP is None:
        def probe(x_ref, o_ref):
            o_ref[...] = pltpu.roll(x_ref[...], 1, 1)

        x = jnp.tile(jnp.arange(128, dtype=jnp.float32), (8, 1))
        y = pl.pallas_call(
            probe, out_shape=jax.ShapeDtypeStruct((8, 128), jnp.float32))(x)
        _ROLL_IS_JNP = bool(jax.device_get(y)[0, 1] == 0.0)
    return _ROLL_IS_JNP


# ----------------------------------------------------------------------------
# Fused DenseBlock kernel (channel-major activations, everything VMEM-resident)
# ----------------------------------------------------------------------------
def _make_dense_block_kernel(cin, k, N, H, W, roll_is_jnp):
    M = N * H * W
    assert cin % 8 == 0 and k % 8 == 0, "channel counts must be sublane-aligned"
    assert M % 128 == 0, "N*H*W must be lane-aligned"

    def shift(x, d):
        # result[:, i] = x[:, (i + d) % M]   (cyclic lane shift via the XLU)
        s = (-d) % M if roll_is_jnp else d % M
        return pltpu.roll(x, s, 1)

    def conv3x3(x, w_ref, b_ref, masks):
        # x: (Cin, M) f32, already activated.  w_ref: (9, Cout, Cin) bf16.
        # b_ref: (Cout, 1) f32 or None.  Returns (Cout, M) f32.
        # Reflection pad: padded[-1] = x[1], padded[L] = x[L-2].
        m_h0, m_hL, m_w0, m_wL = masks
        rows = (
            jnp.where(m_h0, shift(x, W), shift(x, -W)),   # ky=0: source h-1
            x,                                            # ky=1: source h
            jnp.where(m_hL, shift(x, -W), shift(x, W)),   # ky=2: source h+1
        )
        cout = w_ref.shape[1]
        acc = jnp.zeros((cout, M), jnp.float32)
        for ky in range(3):
            xr = rows[ky]
            cols = (
                jnp.where(m_w0, shift(xr, 1), shift(xr, -1)),   # kx=0: w-1
                xr,                                             # kx=1: w
                jnp.where(m_wL, shift(xr, -1), shift(xr, 1)),   # kx=2: w+1
            )
            for kx in range(3):
                tap = cols[kx].astype(jnp.bfloat16)
                acc = acc + jnp.dot(w_ref[ky * 3 + kx], tap,
                                    preferred_element_type=jnp.float32)
        if b_ref is not None:
            acc = acc + b_ref[...]
        return acc

    def batchnorm(v, eps=1e-5):
        # Fresh BatchNorm2d, training mode (gamma=1, beta=0, biased variance):
        # per-channel stats over (N, H, W) == the resident lane axis.
        mean = jnp.mean(v, axis=1, keepdims=True)
        var = jnp.mean(jnp.square(v - mean), axis=1, keepdims=True)
        return (v - mean) * jax.lax.rsqrt(var + eps)

    def relu(v):
        return jnp.maximum(v, 0.0)

    def kernel(x_ref,
               w11_ref, w12_ref, b12_ref,
               w21_ref, b21_ref, w22_ref, b22_ref,
               w31_ref, b31_ref, w32_ref, b32_ref,
               w41_ref, b41_ref, w42_ref, b42_ref,
               out_ref):
        # Lane-position masks computed once (hoisted out of the conv helper).
        lane = jax.lax.broadcasted_iota(jnp.int32, (1, M), 1)
        wpos = lane % W
        hpos = (lane // W) % H
        masks = (hpos == 0, hpos == H - 1, wpos == 0, wpos == W - 1)
        conv = functools.partial(conv3x3, masks=masks)

        # Final layout (rows): [f4 | f3 | f2 | f1 | x0]
        x0 = x_ref[...]
        out_ref[4 * k:4 * k + cin, :] = x0

        # block1: ReLU -> conv -> BN -> ReLU -> conv  (conv1 bias cancelled by BN)
        h = batchnorm(conv(relu(x0), w11_ref, None))
        out_ref[3 * k:4 * k, :] = conv(relu(h), w12_ref, b12_ref)

        # block2: ReLU -> conv -> ReLU -> conv
        x1 = out_ref[3 * k:, :]
        h = conv(relu(x1), w21_ref, b21_ref)
        out_ref[2 * k:3 * k, :] = conv(relu(h), w22_ref, b22_ref)

        # block3: BN -> ReLU -> conv -> ReLU -> conv
        x2 = out_ref[2 * k:, :]
        h = conv(relu(batchnorm(x2)), w31_ref, b31_ref)
        out_ref[k:2 * k, :] = conv(relu(h), w32_ref, b32_ref)

        # block4: ReLU -> conv -> ReLU -> conv
        x3 = out_ref[k:, :]
        h = conv(relu(x3), w41_ref, b41_ref)
        out_ref[0:k, :] = conv(relu(h), w42_ref, b42_ref)

    return kernel


# ----------------------------------------------------------------------------
# Wrapper: layout prep (NCHW -> channel-major), weight packing, pallas_call
# ----------------------------------------------------------------------------
def _prep_w(w):
    # (3, 3, Cin, Cout) -> (9, Cout, Cin) bf16, tap-major, matching the kernel.
    c_in, c_out = w.shape[2], w.shape[3]
    return jnp.transpose(w.reshape(9, c_in, c_out), (0, 2, 1)).astype(jnp.bfloat16)


def _prep_b(b):
    return b.reshape(-1, 1).astype(jnp.float32)


@functools.partial(jax.jit, static_argnames=("roll_is_jnp",))
def _dense_block_fwd(x_nchw, params, *, roll_is_jnp):
    N, C, H, W = x_nchw.shape
    k = params["b1_w2"].shape[-1]
    M = N * H * W
    kernel = _make_dense_block_kernel(C, k, N, H, W, roll_is_jnp)

    x_cm = jnp.transpose(x_nchw, (1, 0, 2, 3)).reshape(C, M).astype(jnp.float32)
    args = (
        x_cm,
        _prep_w(params["b1_w1"]),
        _prep_w(params["b1_w2"]), _prep_b(params["b1_b2"]),
        _prep_w(params["b2_w1"]), _prep_b(params["b2_b1"]),
        _prep_w(params["b2_w2"]), _prep_b(params["b2_b2"]),
        _prep_w(params["b3_w1"]), _prep_b(params["b3_b1"]),
        _prep_w(params["b3_w2"]), _prep_b(params["b3_b2"]),
        _prep_w(params["b4_w1"]), _prep_b(params["b4_b1"]),
        _prep_w(params["b4_w2"]), _prep_b(params["b4_b2"]),
    )
    # Single grid step: all inputs / the output are whole-array VMEM blocks.
    out_cm = pl.pallas_call(
        kernel,
        out_shape=jax.ShapeDtypeStruct((C + 4 * k, M), jnp.float32),
    )(*args)
    return jnp.transpose(out_cm.reshape(C + 4 * k, N, H, W), (1, 0, 2, 3))


def dense_block_forward(x_nchw, params):
    return _dense_block_fwd(x_nchw, params, roll_is_jnp=_roll_matches_jnp_roll())


# ----------------------------------------------------------------------------
# Parameter init (mirrors PyTorch: xavier_uniform_ weights, default conv bias)
# ----------------------------------------------------------------------------
def init_conv(key, cin, cout):
    k1, k2 = jax.random.split(key)
    fan_in, fan_out = cin * 9, cout * 9
    bw = math.sqrt(6.0 / (fan_in + fan_out))              # xavier_uniform_
    w = jax.random.uniform(k1, (3, 3, cin, cout), jnp.float32, -bw, bw)
    bb = 1.0 / math.sqrt(fan_in)                          # default Conv2d bias init
    b = jax.random.uniform(k2, (cout,), jnp.float32, -bb, bb)
    return w, b


def init_dense_block(key, cin, k):
    keys = jax.random.split(key, 8)
    p = {}
    p["b1_w1"], p["b1_b1"] = init_conv(keys[0], cin, 4 * k)
    p["b1_w2"], p["b1_b2"] = init_conv(keys[1], 4 * k, k)
    p["b2_w1"], p["b2_b1"] = init_conv(keys[2], cin + 1 * k, 4 * k)
    p["b2_w2"], p["b2_b2"] = init_conv(keys[3], 4 * k, k)
    p["b3_w1"], p["b3_b1"] = init_conv(keys[4], cin + 2 * k, 4 * k)
    p["b3_w2"], p["b3_b2"] = init_conv(keys[5], 4 * k, k)
    p["b4_w1"], p["b4_b1"] = init_conv(keys[6], cin + 3 * k, 4 * k)
    p["b4_w2"], p["b4_b2"] = init_conv(keys[7], 4 * k, k)
    return p


# ----------------------------------------------------------------------------
# Pure-JAX f32 reference (for numerical validation of the bf16 Pallas path)
# ----------------------------------------------------------------------------
def _conv_ref(x, w, b):
    xp = jnp.pad(x, ((0, 0), (0, 0), (1, 1), (1, 1)), mode="reflect")
    w_oihw = jnp.transpose(w, (3, 2, 0, 1))
    y = jax.lax.conv_general_dilated(
        xp, w_oihw, (1, 1), "VALID",
        dimension_numbers=("NCHW", "OIHW", "NCHW"),
        precision=jax.lax.Precision.HIGHEST)
    return y + b.reshape(1, -1, 1, 1)


def _bn_ref(x, eps=1e-5):
    mean = jnp.mean(x, axis=(0, 2, 3), keepdims=True)
    var = jnp.mean(jnp.square(x - mean), axis=(0, 2, 3), keepdims=True)
    return (x - mean) * jax.lax.rsqrt(var + eps)


def dense_block_ref(x, p):
    relu = lambda t: jnp.maximum(t, 0.0)
    f = _conv_ref(relu(x), p["b1_w1"], p["b1_b1"])
    f = _bn_ref(f)
    f = _conv_ref(relu(f), p["b1_w2"], p["b1_b2"])
    x = jnp.concatenate([f, x], axis=1)
    f = _conv_ref(relu(x), p["b2_w1"], p["b2_b1"])
    f = _conv_ref(relu(f), p["b2_w2"], p["b2_b2"])
    x = jnp.concatenate([f, x], axis=1)
    f = _bn_ref(x)
    f = _conv_ref(relu(f), p["b3_w1"], p["b3_b1"])
    f = _conv_ref(relu(f), p["b3_w2"], p["b3_b2"])
    x = jnp.concatenate([f, x], axis=1)
    f = _conv_ref(relu(x), p["b4_w1"], p["b4_b1"])
    f = _conv_ref(relu(f), p["b4_w2"], p["b4_b2"])
    x = jnp.concatenate([f, x], axis=1)
    return x


# ----------------------------------------------------------------------------
if __name__ == "__main__":
    CHANNEL_IN, K = 32, 8          # DenseBlock(32, 8), as used by the agent
    N, H, W = 2, 16, 16

    key = jax.random.PRNGKey(0)
    k_params, k_input = jax.random.split(key)
    params = init_dense_block(k_params, CHANNEL_IN, K)
    x = jax.random.normal(k_input, (N, CHANNEL_IN, H, W), jnp.float32)

    out = jax.block_until_ready(dense_block_forward(x, params))

    assert out.shape == (N, CHANNEL_IN + 4 * K, H, W), out.shape
    assert bool(jnp.all(jnp.isfinite(out)))

    ref = jax.block_until_ready(jax.jit(dense_block_ref)(x, params))
    max_err = float(jnp.max(jnp.abs(out - ref)))
    # bf16 matmul inputs with f32 accumulation vs. the f32 reference
    assert max_err < 0.1, f"max abs err vs f32 reference: {max_err}"
    print("KERNEL_OK")
</pallas_src>

<mosaic_0001>
module attributes {stable_mosaic.version = 11 : i64} {
  func.func @probe(%arg0: memref<8x128xf32, #tpu.memory_space<vmem>>, %arg1: memref<8x128xf32, #tpu.memory_space<vmem>>) attributes {dimension_semantics = [], scalar_prefetch = 0 : i64, scratch_operands = 0 : i64, tpu.core_type = #tpu.core_type<tc>} {
    %c0 = arith.constant 0 : index
    %c0_0 = arith.constant 0 : index
    %0 = vector.load %arg0[%c0, %c0_0] : memref<8x128xf32, #tpu.memory_space<vmem>>, vector<8x128xf32>
    %c1_i32 = arith.constant 1 : i32
    %1 = tpu.dynamic_rotate %0 by %c1_i32 dim 1 : vector<8x128xf32>, i32 -> vector<8x128xf32>
    %c0_1 = arith.constant 0 : index
    %c0_2 = arith.constant 0 : index
    %2 = vector.load %arg1[%c0_1, %c0_2] : memref<8x128xf32, #tpu.memory_space<vmem>>, vector<8x128xf32>
    tpu.vector_store %arg1[%c0_1, %c0_2], %1 {strides = array<i32>} : memref<8x128xf32, #tpu.memory_space<vmem>>, vector<8x128xf32>,
    return
  }
}

</mosaic_0001>

<bundles_post_ra>
// kernel: tpu_custom_call.1
= control target key start
LH: loop header
LB: loop body
LE: loop exit
PB: predicated region body
PF: predicated region fallthrough
CT: control target
= control target key end

     0   :  { %6 = vsyncpa [#allocation3], 0  ;;  %s118_s0 = inlined_call_operand.hbm [shape: f32[8,128], index: 0, kind: input, shape index: {}]   ;;  %s119_s1 = inlined_call_operand.hbm [shape: f32[8,128], index: 1, kind: output, shape index: {}]  }
   0x1   :  { %7 = vsyncpa [#allocation4], 0  ;;  %s13_s8 = sshll.u32 %s118_s0, 4  ;;  %s99_s9 = smov [#allocation2]   ;;  %s14_s8 = int_to_ptr.hbm [resolvable:$true] %s13_s8 }
   0x2   :  { %s15_s10 = sshll.u32 %s99_s9, 4  ;;  %s16_s10 = int_to_ptr.vmem [resolvable:$true] %s15_s10 }
   0x3   :  { %18 = dma.hbm_to_vmem [thread:$0]  %s14_s8, 128, %s16_s10, [#allocation3]  }
   0x4   :  { %95 = dma.done.wait [#allocation3], 128  }
   0x5   :  { %96 = vsyncadd [#allocation3], 4294967168  ;;  %v23_v0 = vld [vmem:[#allocation2] sm:$0xff]  ;;  %s100_s11 = smov 1   ;;  %s101_s12 = smov [#allocation5]  }
   0x6   :  { %24 = vrot.lane.b32.xlu0 %v23_v0, %s100_s11  ;;  %s32_s13 = sshll.u32 %s101_s12, 4  ;;  %s34_s16 = sshll.u32 %s119_s1, 4  ;;  %s33_s13 = int_to_ptr.vmem [resolvable:$true] %s32_s13  ;;  %s35_s16 = int_to_ptr.hbm [resolvable:$true] %s34_s16 }
  0x78   :  { %v25_v1 = vpop.permute.xlu0 %24 }
  0x79   :  { %26 = vst [vmem:[#allocation5] sm:$0xff] %v25_v1 }
  0x7a   :  { %37 = dma.vmem_to_hbm [thread:$0]  %s33_s13, 128, %s35_s16, [#allocation4]  }
  0x7b   :  { %97 = dma.done.wait [#allocation4], 128  }
  0x7c   :  { %98 = vsyncadd [#allocation4], 4294967168 }
  0x7d   :  { %42 = vsyncpa [#allocation3], 1 }
  0x7e   :  { %43 = vsyncpa [#allocation4], 1 }

</bundles_post_ra>
